<compile_context>
chip_gen: v7x
topology: tpu7x:2x2x1
jax: 0.10.0
libtpu: 0.0.40
codegen_flags: <defaults>
</compile_context>

<pallas_src>
import jax
import jax.numpy as jnp
from jax.experimental import pallas as pl
from jax.experimental.pallas import tpu as pltpu

LANE_CANDIDATES = (1024, 512, 256, 128)
MAX_BLOCK_BYTES = 4 * 1024 * 1024      # ~4 MiB per block (x2 arrays x2 double-buffer = 16 MiB)
MIN_GRID_STEPS = 4                     # keep the pipeline and v7x megacore busy
VMEM_LIMIT_BYTES = 48 * 1024 * 1024    # < 64 MiB physical on v7x, ample headroom on v5e/v6e


def _round_up(x, m):
    return ((x + m - 1) // m) * m


def _sublane(dtype):
    # Native packed sublane granularity: f32 -> 8, bf16/f16 -> 16, int8/fp8 -> 32.
    return max(8, 32 // jnp.dtype(dtype).itemsize)


def _dra_kernel(params_ref, x_ref, o_ref):
    # params_ref: SMEM (5,) f32 -> [a, b, c, d, b/a]
    cdtype = jnp.bfloat16 if x_ref.dtype == jnp.bfloat16 else jnp.float32
    a = params_ref[0].astype(cdtype)
    b = params_ref[1].astype(cdtype)
    c = params_ref[2].astype(cdtype)
    d = params_ref[3].astype(cdtype)
    b_over_a = params_ref[4].astype(cdtype)

    x = x_ref[...].astype(cdtype)
    co = jnp.cos(a * x)                                   # single trig call (VPU polynomial)
    # b/a*(1-cos^2) + c*cos  ==  b/a + cos*(c - b/a*cos)   (saves 2 VALU ops per element)
    res = (x + b_over_a) + co * (c - b_over_a * co) + d * jnp.tanh(b * x)
    o_ref[...] = res.astype(o_ref.dtype)


def dra_forward(x, a, b, c, d):
    """Apply the DRA activation elementwise; any shape, f32/bf16 (compute dtype follows input)."""
    orig_shape = x.shape
    orig_dtype = x.dtype
    n = x.size

    # Widest lane-dense last dim that divides n exactly (no pad in the common case).
    lanes = next((cand for cand in LANE_CANDIDATES if n % cand == 0), 128)
    rows = pl.cdiv(n, lanes)
    padded_n = rows * lanes

    flat = x.reshape(-1)
    if padded_n != n:                  # rare; pads fewer than 128 elements
        flat = jnp.pad(flat, (0, padded_n - n))
    x2d = flat.reshape(rows, lanes)

    # Block selection: large blocks (amortize per-step overhead), but always several grid steps
    # when the input allows it, rounded to the dtype-native sublane granularity.
    sub = _sublane(orig_dtype)
    itemsize = jnp.dtype(orig_dtype).itemsize
    max_block_rows = max(sub, (MAX_BLOCK_BYTES // itemsize // lanes) // sub * sub)
    if rows <= sub:
        block_rows = rows                                  # single block equal to the full dim
    else:
        n_blocks = max(MIN_GRID_STEPS, pl.cdiv(rows, max_block_rows))
        block_rows = min(max_block_rows, _round_up(pl.cdiv(rows, n_blocks), sub))
    grid = pl.cdiv(rows, block_rows)                       # ragged last block handled by Pallas

    # Scalars live in SMEM.  b/a precomputed on host; guard tiny |a| (the true term
    # b*sin(a*x)^2/a -> 0 there, so use 0 instead of overflowing to inf/NaN).
    a_s = jnp.asarray(a, jnp.float32).reshape(())
    b_s = jnp.asarray(b, jnp.float32).reshape(())
    c_s = jnp.asarray(c, jnp.float32).reshape(())
    d_s = jnp.asarray(d, jnp.float32).reshape(())
    ratio = jnp.where(jnp.abs(a_s) > 1e-30, b_s / a_s, 0.0)
    params = jnp.stack([a_s, b_s, c_s, d_s, ratio])

    out2d = pl.pallas_call(
        _dra_kernel,
        out_shape=jax.ShapeDtypeStruct((rows, lanes), orig_dtype),
        grid=(grid,),
        in_specs=[
            pl.BlockSpec(memory_space=pltpu.MemorySpace.SMEM),       # scalar params
            pl.BlockSpec((block_rows, lanes), lambda i: (i, 0)),     # x tile
        ],
        out_specs=pl.BlockSpec((block_rows, lanes), lambda i: (i, 0)),
        compiler_params=pltpu.CompilerParams(
            dimension_semantics=("parallel",),
            vmem_limit_bytes=VMEM_LIMIT_BYTES,
        ),
    )(params, x2d)

    out_flat = out2d.reshape(-1)
    if padded_n != n:
        out_flat = out_flat[:n]
    return out_flat.reshape(orig_shape)


def dra_reference(x, a, b, c, d):
    ax = a * x
    return (x + b * jnp.square(jnp.sin(ax)) / a
            + c * jnp.cos(ax)
            + d * jnp.tanh(b * x))


if __name__ == "__main__":
    key = jax.random.PRNGKey(0)
    kx, ka, kb, kc, kd = jax.random.split(key, 5)

    # Parameters match nn.Parameter(torch.randn(1)): shape (1,) each.
    a = jax.random.normal(ka, (1,), dtype=jnp.float32)
    b = jax.random.normal(kb, (1,), dtype=jnp.float32)
    c = jax.random.normal(kc, (1,), dtype=jnp.float32)
    d = jax.random.normal(kd, (1,), dtype=jnp.float32)

    # Small NCHW-like input.
    x = jax.random.normal(kx, (2, 4, 16, 16), dtype=jnp.float32)

    out = jax.block_until_ready(dra_forward(x, a, b, c, d))
    ref = dra_reference(x, a[0], b[0], c[0], d[0])

    assert out.shape == x.shape
    assert out.dtype == x.dtype
    assert jnp.allclose(out, ref, atol=2e-3, rtol=2e-3), "mismatch vs reference"

    print("KERNEL_OK")
</pallas_src>

<mosaic_0001>
module attributes {stable_mosaic.version = 11 : i64} {
  func.func @_dra_kernel(%arg0: i32, %arg1: memref<5xf32, #tpu.memory_space<smem>>, %arg2: memref<2x1024xf32, #tpu.memory_space<vmem>>, %arg3: memref<2x1024xf32, #tpu.memory_space<vmem>>) attributes {dimension_semantics = [#tpu.dimension_semantics<parallel>], iteration_bounds = array<i64: 1>, scalar_prefetch = 0 : i64, scratch_operands = 0 : i64, tpu.core_type = #tpu.core_type<tc>, window_params = [{transform_indices = @transform_0, window_bounds = array<i64: 5>}, {transform_indices = @transform_1, window_bounds = array<i64: 2, 1024>}, {transform_indices = @transform_2, window_bounds = array<i64: 2, 1024>}]} {
    %c0 = arith.constant 0 : index
    %0 = memref.load %arg1[%c0] : memref<5xf32, #tpu.memory_space<smem>>
    %c1 = arith.constant 1 : index
    %1 = memref.load %arg1[%c1] : memref<5xf32, #tpu.memory_space<smem>>
    %c2 = arith.constant 2 : index
    %2 = memref.load %arg1[%c2] : memref<5xf32, #tpu.memory_space<smem>>
    %c3 = arith.constant 3 : index
    %3 = memref.load %arg1[%c3] : memref<5xf32, #tpu.memory_space<smem>>
    %c4 = arith.constant 4 : index
    %4 = memref.load %arg1[%c4] : memref<5xf32, #tpu.memory_space<smem>>
    %c0_0 = arith.constant 0 : index
    %c0_1 = arith.constant 0 : index
    %5 = vector.load %arg2[%c0_0, %c0_1] : memref<2x1024xf32, #tpu.memory_space<vmem>>, vector<2x1024xf32>
    %6 = vector.broadcast %0 : f32 to vector<2x1024xf32>
    %7 = arith.mulf %6, %5 : vector<2x1024xf32>
    %8 = math.cos %7 : vector<2x1024xf32>
    %9 = vector.broadcast %4 : f32 to vector<2x1024xf32>
    %10 = arith.addf %5, %9 : vector<2x1024xf32>
    %11 = vector.broadcast %4 : f32 to vector<2x1024xf32>
    %12 = arith.mulf %11, %8 : vector<2x1024xf32>
    %13 = vector.broadcast %2 : f32 to vector<2x1024xf32>
    %14 = arith.subf %13, %12 : vector<2x1024xf32>
    %15 = arith.mulf %8, %14 : vector<2x1024xf32>
    %16 = arith.addf %10, %15 : vector<2x1024xf32>
    %17 = vector.broadcast %1 : f32 to vector<2x1024xf32>
    %18 = arith.mulf %17, %5 : vector<2x1024xf32>
    %19 = math.tanh %18 : vector<2x1024xf32>
    %20 = vector.broadcast %3 : f32 to vector<2x1024xf32>
    %21 = arith.mulf %20, %19 : vector<2x1024xf32>
    %22 = arith.addf %16, %21 : vector<2x1024xf32>
    %c0_2 = arith.constant 0 : index
    %c0_3 = arith.constant 0 : index
    %23 = vector.load %arg3[%c0_2, %c0_3] : memref<2x1024xf32, #tpu.memory_space<vmem>>, vector<2x1024xf32>
    tpu.vector_store %arg3[%c0_2, %c0_3], %22 {strides = array<i32>} : memref<2x1024xf32, #tpu.memory_space<vmem>>, vector<2x1024xf32>,
    return
  }
  func.func @transform_0(%arg0: i32) -> i32 {
    %c0_i32 = arith.constant 0 : i32
    %c0_i32_0 = arith.constant 0 : i32
    return %c0_i32 : i32
  }
  func.func @transform_1(%arg0: i32) -> (i32, i32) {
    %c0_i32 = arith.constant 0 : i32
    %c0_i32_0 = arith.constant 0 : i32
    return %arg0, %c0_i32 : i32, i32
  }
  func.func @transform_2(%arg0: i32) -> (i32, i32) {
    %c0_i32 = arith.constant 0 : i32
    %c0_i32_0 = arith.constant 0 : i32
    return %arg0, %c0_i32 : i32, i32
  }
}

</mosaic_0001>

<bundles_post_ra>
// kernel: tpu_custom_call.1
= control target key start
LH: loop header
LB: loop body
LE: loop exit
PB: predicated region body
PF: predicated region fallthrough
CT: control target
= control target key end

     0   :  { %7 = vsyncpa [#allocation5], 0  ;;  %s557_s0 = inlined_call_operand.hbm [shape: f32[5], index: 0, kind: input, shape index: {}]   ;;  %s558_s1 = inlined_call_operand.hbm [shape: f32[2,1024], index: 1, kind: input, shape index: {}]   ;;  %s559_s2 = inlined_call_operand.hbm [shape: f32[2,1024], index: 2, kind: output, shape index: {}]  }
   0x1   :  { %8 = vsyncpa [#allocation3], 0 }
   0x2   :  { %9 = vsyncpa [#allocation4], 0  ;;  %s332_s11 = scalar_lea.hbm %s557_s0, 16 }
   0x3   :  { %p333_p0 = scmp.ne.s32.totalorder %s557_s0, %s332_s11  ;;  %p336_p1 = scmp.lt.u32.totalorder %s332_s11, %s557_s0 }
   0x5   :  { %p338_p2 = pnand %p336_p1, %p333_p0 }
   0x7   :  { %341 = shalt.err (!%p338_p2)
}
   0x8   :  { %s392_s16 = smov [#allocation2]   ;;  %s393_s19 = smov [#allocation6]  }
   0x9   :  { %17 = dma.hbm_to_smem %s557_s0, 16, %s392_s16, [#allocation5]  }
   0xa   :  { %s24_s20 = sshll.u32 %s393_s19, 4  ;;  %s342_s23 = scalar_lea.hbm %s558_s1, 256  ;;  %s25_s20 = int_to_ptr.vmem [resolvable:$true] %s24_s20 }
   0xb   :  { %p343_p3 = scmp.ne.s32.totalorder %s558_s1, %s342_s23  ;;  %p346_p4 = scmp.lt.u32.totalorder %s342_s23, %s558_s1 }
   0xd   :  { %p348_p5 = pnand %p346_p4, %p343_p3 }
   0xf   :  { %351 = shalt.err (!%p348_p5)
}
  0x10   :  { %s352_s28 = scalar_lea.vmem %s25_s20, 256  ;;  %p357_p7 = scmp.lt.s32.totalorder %s25_s20, %s25_s20 }
  0x11   :  { %p353_p6 = scmp.ne.s32.totalorder %s25_s20, %s352_s28  ;;  %p358_p8 = scmp.lt.s32.totalorder %s352_s28, %s352_s28 }
  0x13   :  { %p359_p9 = por %p358_p8, %p357_p7 }
  0x15   :  { %p360_p10 = pnand %p359_p9, %p353_p6 }
  0x17   :  { %363 = shalt.err (!%p360_p10)
}
  0x18   :  { %27 = dma.hbm_to_vmem [thread:$0]  %s558_s1, 256, %s25_s20, [#allocation3]  }
  0x19   :  { %386 = dma.done.wait [#allocation5], 16  }
  0x1a   :  { %387 = vsyncadd [#allocation5], 4294967280 }
  0x1b   :  { %388 = dma.done.wait [#allocation3], 256  }
  0x1c   :  { %389 = vsyncadd [#allocation3], 4294967040 }
  0x1d   :  { %34 = sfence }
  0x1e   :  { %s35_s30 = sld [smem:[#allocation2]]  ;;  %v440_v0 = vld [vmem:[#allocation6] sm:$0xff]  ;;  %v442_v1 = vld [vmem:[#allocation6 + $0x8] sm:$0xff]  ;;  %v394_v27 = vmov 683565275   ;;  %s506_s1 = sld [smem:[#allocation2 + $0x1]] }
  0x1f   :  { %v395_v29 = vmov 2475754826   ;;  %v396_v31 = vmov 2131351028   ;;  %v397_v33 = vmov 2102212464  }
  0x20   :  { %v398_v35 = vmov 920167782   ;;  %v399_v43 = vmov 1326507024   ;;  %s294_s3 = sld [smem:[#allocation2 + $0x4]]  ;;  %s529_s4 = sld [smem:[#allocation2 + $0x2]] }
  0x21   :  { %s534_s5 = sld [smem:[#allocation2 + $0x3]]  ;;  %s400_s6 = smov [#allocation7]  }
  0x22   :  { %s281_s7 = sshll.u32 %s400_s6, 4  ;;  %s282_s7 = int_to_ptr.vmem [resolvable:$true] %s281_s7 }
  0x23   :  { %s364_s8 = scalar_lea.vmem %s282_s7, 256  ;;  %p369_p12 = scmp.lt.s32.totalorder %s282_s7, %s282_s7 }
  0x24   :  { %v42_v2 = vstv %s35_s30  ;;  %p365_p11 = scmp.ne.s32.totalorder %s282_s7, %s364_s8  ;;  %p370_p13 = scmp.lt.s32.totalorder %s364_s8, %s364_s8 }
  0x25   :  { %v445_v3 = vmul.f32 %v42_v2, %v440_v0  ;;  %v448_v4 = vmul.f32 %v42_v2, %v442_v1 }
  0x26   :  { %p371_p0 = por %p370_p13, %p369_p12 }
  0x27   :  { %v45_v5 = vand.u32 2147483647, %v445_v3  ;;  %v48_v6 = vand.u32 2139095040, %v445_v3  ;;  %v148_v7 = vand.u32 2147483647, %v448_v4  ;;  %v151_v8 = vand.u32 2139095040, %v448_v4 }
  0x28   :  { %vm47_vm14 = vcmp.lt.s32.totalorder %v445_v3, 0  ;;  %p372_p1 = pnand %p371_p0, %p365_p11 }
  0x29   :  { %v49_v9 = vshrl.u32 %v48_v6, 23  ;;  %v52_v10 = vand.u32 8388607, %v45_v5  ;;  %v152_v11 = vshrl.u32 %v151_v8, 23  ;;  %v155_v12 = vand.u32 8388607, %v148_v7 }
  0x2a   :  { %vm511_vm15 = vcmp.le.f32.partialorder %v45_v5, 0.7853982 }
  0x2b   :  { %v295_v13 = vadd.s32 4294967169, %v49_v9  ;;  %v299_v14 = vadd.s32 4294967169, %v152_v11  ;;  %v53_v16 = vor.u32 8388608, %v52_v10  ;;  %v156_v17 = vor.u32 8388608, %v155_v12 }
  0x2d   :  { %v55_v15 = vadd.s32 1, %v295_v13  ;;  %v158_v18 = vadd.s32 1, %v299_v14  ;;  %v458_v23 = vshll.u32 %v53_v16, 8  ;;  %v460_v25 = vshll.u32 %v156_v17, 8 }
  0x2f   :  { %vm56_vm0 = vcmp.gt.s32.totalorder %v55_v15, 0  ;;  %vm159_vm1 = vcmp.gt.s32.totalorder %v158_v18, 0 }
  0x30   :  { %v57_v19 = vsel %vm56_vm0, %v55_v15, 0  ;;  %v160_v22 = vsel %vm159_vm1, %v158_v18, 0  ;;  %vm150_vm0 = vcmp.lt.s32.totalorder %v448_v4, 0  ;;  %vm525_vm1 = vcmp.le.f32.partialorder %v148_v7, 0.7853982 }
  0x31   :  { %v58_v20 = vshrl.u32 %v57_v19, 5  ;;  %v59_v21 = vand.u32 31, %v57_v19  ;;  %v162_v24 = vand.u32 31, %v160_v22  ;;  %v462_v37 = vshrl.u32 %v160_v22, 5 }
  0x33   :  { %v60_v26 = vsub.s32 32, %v59_v21  ;;  %v62_v28 = vshll.u32 %v394_v27, %v59_v21  ;;  %v65_v30 = vshll.u32 %v395_v29, %v59_v21  ;;  %v68_v32 = vshll.u32 %v396_v31, %v59_v21 }
  0x34   :  { %v71_v34 = vshll.u32 %v397_v33, %v59_v21  ;;  %v74_v36 = vshll.u32 %v398_v35, %v59_v21  ;;  %vm77_vm2 = vcmp.lt.s32.totalorder %v58_v20, 1  ;;  %vm78_vm3 = vcmp.lt.s32.totalorder %v58_v20, 2 }
  0x35   :  { %v61_v38 = vshrl.u32 %v394_v27, %v60_v26  ;;  %v63_v39 = vshrl.u32 %v395_v29, %v60_v26  ;;  %v66_v40 = vshrl.u32 %v396_v31, %v60_v26  ;;  %v69_v41 = vshrl.u32 %v397_v33, %v60_v26 }
  0x36   :  { %v72_v42 = vshrl.u32 %v398_v35, %v60_v26  ;;  %v75_v44 = vshrl.u32 %v399_v43, %v60_v26  ;;  %vm80_vm4 = vcmp.lt.s32.totalorder %v58_v20, 4  ;;  %v163_v48 = vsub.s32 32, %v162_v24 }
  0x37   :  { %v64_v45 = vor.u32 %v63_v39, %v62_v28  ;;  %v67_v46 = vor.u32 %v66_v40, %v65_v30  ;;  %v70_v47 = vor.u32 %v69_v41, %v68_v32  ;;  %vm79_vm5 = vcmp.lt.s32.totalorder %v58_v20, 3 }
  0x38   :  { %v73_v49 = vor.u32 %v72_v42, %v71_v34  ;;  %v76_v50 = vor.u32 %v75_v44, %v74_v36  ;;  %v165_v51 = vshll.u32 %v394_v27, %v162_v24  ;;  %v168_v59 = vshll.u32 %v395_v29, %v162_v24 }
  0x39   :  { %v81_v52 = vsel %vm77_vm2, %v61_v38, %v64_v45  ;;  %v82_v53 = vsel %vm80_vm4, %v70_v47, 2102212464  ;;  %v85_v54 = vsel %vm77_vm2, %v64_v45, %v67_v46  ;;  %v89_v55 = vsel %vm77_vm2, %v67_v46, %v70_v47 }
  0x3a   :  { %v83_v56 = vsel %vm79_vm5, %v67_v46, %v82_v53  ;;  %v86_v57 = vsel %vm80_vm4, %v73_v49, 920167782  ;;  %v90_v58 = vsel %vm80_vm4, %v76_v50, 1326507024  ;;  %v164_v62 = vshrl.u32 %v394_v27, %v163_v48 }
  0x3b   :  { %v87_v60 = vsel %vm79_vm5, %v70_v47, %v86_v57  ;;  %v91_v61 = vsel %vm79_vm5, %v73_v49, %v90_v58  ;;  %v166_v63 = vshrl.u32 %v395_v29, %v163_v48  ;;  %v84_v2 = vsel %vm78_vm3, %v81_v52, %v83_v56 }
  0x3c   :  { %v88_v6 = vsel %vm78_vm3, %v85_v54, %v87_v60  ;;  %v92_v8 = vsel %vm78_vm3, %v89_v55, %v91_v61  ;;  %v169_v9 = vshrl.u32 %v396_v31, %v163_v48  ;;  %v171_v16 = vshll.u32 %v396_v31, %v162_v24 }
  0x3d   :  { %v471_v10 = vmul.u32.u64.low %v458_v23, %v92_v8  ;;  %v472_v11 = vmul.u32.u64.high %v458_v23, %v92_v8, %v471_v10  ;;  %v475_v12 = vmul.u32.u64.low %v458_v23, %v88_v6  ;;  %v476_v13 = vmul.u32.u64.high %v458_v23, %v88_v6, %v475_v12 }
  0x3e   :  { %v167_v14 = vor.u32 %v166_v63, %v165_v51  ;;  %v170_v15 = vor.u32 %v169_v9, %v168_v59  ;;  %v172_v17 = vshrl.u32 %v397_v33, %v163_v48  ;;  %v174_v18 = vshll.u32 %v397_v33, %v162_v24 }
  0x3f   :  { %v175_v19 = vshrl.u32 %v398_v35, %v163_v48  ;;  %v177_v21 = vshll.u32 %v398_v35, %v162_v24  ;;  %v178_v22 = vshrl.u32 %v399_v43, %v163_v48  ;;  %v100_v20 = vmul.u32 %v458_v23, %v84_v2 }
  0x40   :  { %v173_v26 = vor.u32 %v172_v17, %v171_v16  ;;  %vm180_vm6 = vcmp.lt.s32.totalorder %v462_v37, 1  ;;  %vm181_vm7 = vcmp.lt.s32.totalorder %v462_v37, 2  ;;  %vm102_vm8 = vc.u32 %v472_v11, %v475_v12 }
  0x41   :  { %v103_v27 = vadd.s32 1, %v476_v13  ;;  %v176_v28 = vor.u32 %v175_v19, %v174_v18  ;;  %vm182_vm9 = vcmp.lt.s32.totalorder %v462_v37, 3  ;;  %v179_v29 = vor.u32 %v178_v22, %v177_v21 }
  0x42   :  { %vm183_vm10 = vcmp.lt.s32.totalorder %v462_v37, 4  ;;  %v184_v30 = vsel %vm180_vm6, %v164_v62, %v167_v14  ;;  %v188_v24 = vsel %vm180_vm6, %v167_v14, %v170_v15  ;;  %v192_v33 = vsel %vm180_vm6, %v170_v15, %v173_v26 }
  0x43   :  { %v104_v31 = vsel %vm102_vm8, %v103_v27, %v476_v13  ;;  %v185_v23 = vsel %vm183_vm10, %v173_v26, 2102212464  ;;  %v189_v32 = vsel %vm183_vm10, %v176_v28, 920167782  ;;  %v193_v38 = vsel %vm183_vm10, %v179_v29, 1326507024 }
  0x44   :  { %v105_v34 = vadd.s32 %v104_v31, %v100_v20  ;;  %v186_v35 = vsel %vm182_vm9, %v170_v15, %v185_v23  ;;  %v190_v36 = vsel %vm182_vm9, %v173_v26, %v189_v32  ;;  %v194_v41 = vsel %vm182_vm9, %v176_v28, %v193_v38 }
  0x45   :  { %v187_v39 = vsel %vm181_vm7, %v184_v30, %v186_v35  ;;  %v191_v40 = vsel %vm181_vm7, %v188_v24, %v190_v36  ;;  %v195_v43 = vsel %vm181_vm7, %v192_v33, %v194_v41  ;;  %v101_v62 = vadd.s32 %v475_v12, %v472_v11 }
  0x46   :  { %v106_v42 = vadd.s32 536870912, %v105_v34  ;;  %v493_v44 = vmul.u32.u64.low %v460_v25, %v191_v40  ;;  %v494_v45 = vmul.u32.u64.high %v460_v25, %v191_v40, %v493_v44  ;;  %v203_v49 = vmul.u32 %v460_v25, %v187_v39 }
  0x47   :  { %v497_v46 = vmul.u32.u64.low %v460_v25, %v195_v43  ;;  %v498_v47 = vmul.u32.u64.high %v460_v25, %v195_v43, %v497_v46  ;;  %v263_v40 = vstv %s506_s1  ;;  %vm137_vm5 = vweird.f32 %v445_v3 }
  0x48   :  { %v107_v48 = vshrl.u32 %v106_v42, 30  ;;  %v206_v51 = vadd.s32 1, %v494_v45  ;;  %v264_v42 = vmul.f32 %v263_v40, %v440_v0  ;;  %vm240_vm9 = vweird.f32 %v448_v4 }
  0x49   :  { %vm205_vm11 = vc.u32 %v498_v47, %v493_v44  ;;  %v204_v21 = vadd.s32 %v493_v44, %v498_v47 }
  0x4a   :  { %v108_v50 = vshll.u32 %v107_v48, 30  ;;  %v207_v37 = vsel %vm205_vm11, %v206_v51, %v494_v45  ;;  %v131_v31 = vsub.s32 4, %v107_v48 }
  0x4b   :  { %v208_v53 = vadd.s32 %v207_v37, %v203_v49 }
  0x4c   :  { %v109_v52 = vsub.s32 %v105_v34, %v108_v50  ;;  %v132_v38 = vsel %vm47_vm14, %v131_v31, %v107_v48 }
  0x4d   :  { %v209_v55 = vadd.s32 536870912, %v208_v53  ;;  %v134_v5 = vsel %vm511_vm15, 0, %v132_v38 }
  0x4e   :  { %v111_v54 = vsub.s32 0, %v109_v52  ;;  %v138_v46 = vand.u32 3, %v134_v5 }
  0x4f   :  { %v210_v57 = vshrl.u32 %v209_v55, 30 }
  0x50   :  { %v296_v56 = vmin.u32 %v111_v54, %v109_v52  ;;  %vm143_vm2 = vcmp.eq.s32.totalorder %v138_v46, 2  ;;  %vm140_vm3 = vcmp.eq.s32.totalorder %v138_v46, 0  ;;  %vm139_vm4 = vcmp.lt.s32.totalorder %v138_v46, 2 }
  0x51   :  { %v211_v59 = vshll.u32 %v210_v57, 30  ;;  %v234_v45 = vsub.s32 4, %v210_v57  ;;  %v265_v54 = vmul.f32 %v263_v40, %v442_v1 }
  0x52   :  { %v113_v58 = vclz %v296_v56  ;;  %v251_v56 = vstv %s294_s3 }
  0x53   :  { %v212_v61 = vsub.s32 %v208_v53, %v211_v59  ;;  %v235_v49 = vsel %vm150_vm0, %v234_v45, %v210_v57 }
  0x54   :  { %v297_v60 = vadd.s32 4294967294, %v113_v58  ;;  %v237_v37 = vsel %vm525_vm1, 0, %v235_v49 }
  0x55   :  { %v214_v63 = vsub.s32 0, %v212_v61  ;;  %v241_v58 = vand.u32 3, %v237_v37 }
  0x56   :  { %vm298_vm12 = vcmp.lt.s32.totalorder %v297_v60, 0 }
  0x57   :  { %v116_v25 = vsel %vm298_vm12, 0, %v297_v60  ;;  %v300_v9 = vmin.u32 %v214_v63, %v212_v61  ;;  %v256_v60 = vstv %s529_s4  ;;  %vm246_vm6 = vcmp.eq.s32.totalorder %v241_v58, 2 }
  0x58   :  { %v117_v2 = vsub.s32 32, %v116_v25  ;;  %v118_v6 = vshll.u32 %v109_v52, %v116_v25  ;;  %v121_v8 = vsub.s32 4294967266, %v116_v25  ;;  %v268_v25 = vstv %s534_s5 }
  0x59   :  { %v216_v14 = vclz %v300_v9  ;;  %vm243_vm7 = vcmp.eq.s32.totalorder %v241_v58, 0  ;;  %vm242_vm8 = vcmp.lt.s32.totalorder %v241_v58, 2 }
  0x5a   :  { %v119_v10 = vshrl.u32 %v101_v62, %v117_v2  ;;  %v122_v13 = vadd.s32 127, %v121_v8  ;;  %v252_v2 = vadd.f32 %v251_v56, %v440_v0  ;;  %v253_v0 = vadd.f32 %v251_v56, %v442_v1 }
  0x5b   :  { %v301_v17 = vadd.s32 4294967294, %v216_v14 }
  0x5c   :  { %v120_v15 = vor.u32 %v119_v10, %v118_v6  ;;  %v123_v16 = vshll.u32 %v122_v13, 23 }
  0x5d   :  { %vm302_vm13 = vcmp.lt.s32.totalorder %v301_v17, 0 }
  0x5e   :  { %v124_v18 = vor.u32 4788187, %v123_v16  ;;  %v127_v19 = vcvt.s32.f32 %v120_v15  ;;  %v219_v11 = vsel %vm302_vm13, 0, %v301_v17 }
  0x5f   :  { %v220_v12 = vsub.s32 32, %v219_v11  ;;  %v221_v20 = vshll.u32 %v212_v61, %v219_v11  ;;  %v224_v26 = vsub.s32 4294967266, %v219_v11 }
  0x60   :  { %v125_v22 = vand.u32 2147483647, %v124_v18 }
  0x61   :  { %v222_v28 = vshrl.u32 %v204_v21, %v220_v12  ;;  %v225_v29 = vadd.s32 127, %v224_v26 }
  0x62   :  { %v128_v27 = vmul.f32 %v127_v19, %v125_v22 }
  0x63   :  { %v223_v23 = vor.u32 %v222_v28, %v221_v20  ;;  %v226_v32 = vshll.u32 %v225_v29, 23 }
  0x64   :  { %v129_v24 = vxor.u32 2147483648, %v128_v27 }
  0x65   :  { %v227_v35 = vor.u32 4788187, %v226_v32  ;;  %v230_v36 = vcvt.s32.f32 %v223_v23 }
  0x66   :  { %v130_v33 = vsel %vm47_vm14, %v129_v24, %v128_v27 }
  0x67   :  { %v133_v34 = vsel %vm511_vm15, %v445_v3, %v130_v33  ;;  %v228_v39 = vand.u32 2147483647, %v227_v35 }
  0x68   :  { %320 = vcosq.f32 %v133_v34 }
  0x69   :  { %322 = vsinq.f32 %v133_v34  ;;  %v231_v41 = vmul.f32 %v230_v36, %v228_v39 }
  0x6a   :  { %324 = vtanh.f32 %v264_v42 }
  0x6b   :  { %v232_v44 = vxor.u32 2147483648, %v231_v41 }
  0x6d   :  { %v233_v47 = vsel %vm150_vm0, %v232_v44, %v231_v41 }
  0x6e   :  { %v236_v48 = vsel %vm525_vm1, %v448_v4, %v233_v47 }
  0x6f   :  { %326 = vcosq.f32 %v236_v48 }
  0x70   :  { %328 = vsinq.f32 %v236_v48 }
  0x71   :  { %330 = vtanh.f32 %v265_v54 }
  0x72   :  { %v321_v50 = vpop.eup %320 }
  0x73   :  { %v323_v7 = vpop.eup %322  ;;  %v144_v51 = vxor.u32 2147483648, %v321_v50 }
  0x74   :  { %v141_v52 = vxor.u32 2147483648, %v323_v7  ;;  %v325_v62 = vpop.eup %324 }
  0x75   :  { %v145_v53 = vsel %vm143_vm2, %v144_v51, %v323_v7  ;;  %v269_v13 = vmul.f32 %v325_v62, %v268_v25 }
  0x76   :  { %v142_v55 = vsel %vm140_vm3, %v321_v50, %v141_v52 }
  0x77   :  { %v146_v57 = vsel %vm139_vm4, %v142_v55, %v145_v53 }
  0x78   :  { %v147_v59 = vsel %vm137_vm5, nan, %v146_v57 }
  0x79   :  { %v254_v61 = vmul.f32 %v251_v56, %v147_v59  ;;  %v327_v63 = vpop.eup %326 }
  0x7a   :  { %v329_v8 = vpop.eup %328  ;;  %v247_v3 = vxor.u32 2147483648, %v327_v63 }
  0x7b   :  { %v257_v6 = vsub.f32 %v256_v60, %v254_v61  ;;  %v244_v9 = vxor.u32 2147483648, %v329_v8  ;;  %v331_v22 = vpop.eup %330 }
  0x7c   :  { %v248_v14 = vsel %vm246_vm6, %v247_v3, %v329_v8  ;;  %v270_v20 = vmul.f32 %v331_v22, %v268_v25 }
  0x7d   :  { %v259_v10 = vmul.f32 %v257_v6, %v147_v59  ;;  %v245_v15 = vsel %vm243_vm7, %v327_v63, %v244_v9 }
  0x7e   :  { %v249_v17 = vsel %vm242_vm8, %v245_v15, %v248_v14 }
  0x7f   :  { %v261_v16 = vadd.f32 %v259_v10, %v252_v2  ;;  %v250_v18 = vsel %vm240_vm9, nan, %v249_v17 }
  0x80   :  { %v255_v21 = vmul.f32 %v251_v56, %v250_v18 }
  0x81   :  { %v271_v19 = vadd.f32 %v269_v13, %v261_v16 }
  0x82   :  { %v258_v11 = vsub.f32 %v256_v60, %v255_v21 }
  0x83   :  { %273 = vst [vmem:[#allocation7] sm:$0xff] %v271_v19 }
  0x84   :  { %v260_v12 = vmul.f32 %v258_v11, %v250_v18 }
  0x86   :  { %v262_v26 = vadd.f32 %v260_v12, %v253_v0 }
  0x88   :  { %v272_v27 = vadd.f32 %v270_v20, %v262_v26 }
  0x8a   :  { %274 = vst [vmem:[#allocation7 + $0x8] sm:$0xff] %v272_v27 }
  0x8b   :  { %375 = shalt.err (!%p372_p1)
}
  0x8c   :  { %s376_s11 = scalar_lea.hbm %s559_s2, 256 }
  0x8d   :  { %p377_p2 = scmp.ne.s32.totalorder %s559_s2, %s376_s11  ;;  %p380_p3 = scmp.lt.u32.totalorder %s376_s11, %s559_s2 }
  0x8f   :  { %p382_p4 = pnand %p380_p3, %p377_p2 }
  0x91   :  { %385 = shalt.err (!%p382_p4)
}
  0x92   :  { %284 = dma.vmem_to_hbm [thread:$0]  %s282_s7, 256, %s559_s2, [#allocation4]  }
  0x93   :  { %390 = dma.done.wait [#allocation4], 256  }
  0x94   :  { %391 = vsyncadd [#allocation4], 4294967040 }
  0x95   :  { %288 = vsyncpa [#allocation3], 1 }
  0x96   :  { %289 = vsyncpa [#allocation4], 1 }
  0x97   :  { %290 = vsyncpa [#allocation5], 1 }

</bundles_post_ra>
